<compile_context>
chip_gen: v7x
topology: tpu7x:2x2x1
jax: 0.10.0
libtpu: 0.0.40
codegen_flags: <defaults>
</compile_context>

<pallas_src>
import jax
import jax.numpy as jnp
from jax import lax
from jax.experimental import pallas as pl
from jax.experimental.pallas import tpu as pltpu


def _round_up(x, m):
    return (x + m - 1) // m * m


def _cdiv(a, b):
    return -(-a // b)


# --------------------- generation-aware VMEM sizing ------------------------

def _vmem_profile():
    """(sizing_budget, vmem_limit_ceiling, max_batch_tile_rows) per TPU gen."""
    cap = 64 << 20                       # conservative fallback (v7x-sized)
    try:
        cap = int(getattr(pltpu.get_tpu_info(), "vmem_capacity_bytes", cap))
    except Exception:
        pass
    if cap >= (96 << 20):                # v5e / v6e: 128 MiB physical VMEM
        return (cap * 3) // 4, cap - (16 << 20), 2048
    # v7x-class: 64 MiB physical VMEM per TensorCore -> tight headroom.
    return 40 << 20, 50 << 20, 1024


def _choose_tiling(B, D, c_sub, x_bytes, out_bytes, sub_align, budget, row_cap):
    """Returns (tile_b, b_padded, tile_k, nk)."""
    headroom = 2 << 20

    def rows_fit(tk):
        fixed = 2 * c_sub * tk * x_bytes + c_sub * 4 + headroom
        avail = budget - fixed
        if avail <= 0:
            return 0
        per_row = 2 * tk * x_bytes + 2 * c_sub * out_bytes + c_sub * 4
        return avail // per_row

    # K (feature) blocking only when an unblocked D would force a tiny batch
    # tile (very large bottleneck_dim).  Chunks must divide D and be 128-wide
    # multiples so x never needs padding along D.
    tile_k, nk = D, 1
    if rows_fit(D) < 256 and D % 128 == 0:
        for cand in range(2, 65):
            if D % cand:
                continue
            tk = D // cand
            if tk % 128:
                continue
            if rows_fit(tk) >= 256:
                tile_k, nk = tk, cand
                break

    max_rows = rows_fit(tile_k)

    if B <= 128:
        # Single batch step: the output block's lane dim equals the full padded
        # batch, so only sublane (dtype-packing) alignment is required.
        tile_b = _round_up(max(B, sub_align), sub_align)
        return tile_b, tile_b, tile_k, nk

    # Multi-step: output lanes must stay 128-dense -> 128-aligned batch tiles,
    # balanced over >=2 steps (megacore) so padding waste is bounded.
    b128 = _round_up(B, 128)
    cap_rows = max(128, min(row_cap, (max_rows // 128) * 128))
    n_steps = max(2, _cdiv(b128, cap_rows))
    tile_b = _cdiv(b128 // 128, n_steps) * 128
    n_steps = _cdiv(b128, tile_b)
    return tile_b, n_steps * tile_b, tile_k, nk


# -------------------------------- kernel -----------------------------------

def _fused_affine_kernel(x_ref, w_ref, b_ref, o_ref, acc_ref):
    k = pl.program_id(1)

    @pl.when(k == 0)
    def _():
        acc_ref[...] = jnp.zeros_like(acc_ref)

    x = x_ref[...]                       # (tile_b, tile_k), streamed dtype
    w = w_ref[...]                       # (c_sub, tile_k)
    if w.dtype != x.dtype:
        # Tiny per-chunk convert so the MXU sees matching dtypes; the large x
        # stream is never re-cast (no extra HBM pass in the wrapper).
        w = w.astype(x.dtype)

    # (c_sub, tile_b) partial product: contract the feature dim of BOTH
    # operands (rhs-transposed MXU matmul, same pattern as q @ k.T).
    acc_ref[...] += lax.dot_general(
        w, x,
        dimension_numbers=(((1,), (1,)), ((), ())),
        preferred_element_type=jnp.float32)

    @pl.when(k == pl.num_programs(1) - 1)
    def _():
        # Bias add in f32 (v5e VPU has no bf16 ALU); cast only at the store.
        o_ref[...] = (acc_ref[...] + b_ref[...]).astype(o_ref.dtype)


# ----------------------------- public wrappers ------------------------------

def prepare_following_extractor(w1, b1, w2, b2, *, compute_dtype=jnp.bfloat16):
    """One-time parameter prep.  Hoist this out of the forward loop (or cache
    it keyed on the weights) so the hot path is a single pallas_call.

    Returns (w_t, b_t, class_num):
      w_t : (c_sub, D) fused weight, TRANSPOSED, class dim padded to 8 sublanes
      b_t : (c_sub, 1) fused bias, kept f32
    """
    D, H = w1.shape
    C = w2.shape[1]
    assert w1.shape == (D, H) and b1.shape == (1, H)
    assert w2.shape == (H, C) and b2.shape == (1, C)

    w_fused = jnp.dot(w1.astype(jnp.float32), w2.astype(jnp.float32))          # (D, C)
    b_fused = (jnp.dot(b1.astype(jnp.float32), w2.astype(jnp.float32))
               + b2.astype(jnp.float32))                                       # (1, C)

    c_sub = _round_up(C, 8)
    w_t = jnp.zeros((c_sub, D), compute_dtype).at[:C, :].set(
        w_fused.T.astype(compute_dtype))
    b_t = jnp.zeros((c_sub, 1), jnp.float32).at[:C, :].set(b_fused.T)
    return w_t, b_t, C


def following_extractor_fused(x, w_t, b_t, class_num, *, vmem_budget_bytes=None):
    """Hot path: y = x @ W_fused + b_fused as one Pallas GEMM.

    x is streamed in its own dtype; output dtype == x.dtype.
    vmem_budget_bytes overrides the generation-derived sizing budget (testing /
    manual tuning only).
    """
    B, D = x.shape
    c_sub, Dw = w_t.shape
    assert Dw == D and b_t.shape == (c_sub, 1) and class_num <= c_sub

    out_dtype = x.dtype
    x_bytes = jnp.dtype(x.dtype).itemsize
    out_bytes = jnp.dtype(out_dtype).itemsize
    sub_align = {1: 32, 2: 16}.get(x_bytes, 8)   # avoid half-packed sublanes

    budget, limit_ceiling, row_cap = _vmem_profile()
    if vmem_budget_bytes is not None:
        budget = int(vmem_budget_bytes)

    tile_b, b_padded, tile_k, nk = _choose_tiling(
        B, D, c_sub, x_bytes, out_bytes, sub_align, budget, row_cap)
    nb = b_padded // tile_b

    x_p = x
    if b_padded != B:
        x_p = jnp.zeros((b_padded, D), x.dtype).at[:B, :].set(x)

    needed = (2 * tile_b * tile_k * x_bytes        # x tile, double-buffered
              + 2 * c_sub * tile_b * out_bytes     # sublane-packed out tile
              + 2 * c_sub * tile_k * x_bytes       # fused-weight chunk
              + c_sub * tile_b * 4                 # f32 accumulator scratch
              + c_sub * 4)                         # bias
    vmem_limit = int(min(limit_ceiling, max(needed + (4 << 20), 16 << 20)))

    flops = 2 * b_padded * D * c_sub
    bytes_accessed = (b_padded * D * x_bytes + c_sub * D * x_bytes
                      + c_sub * 4 + c_sub * b_padded * out_bytes)

    # NOTE: fused W / bias are tiny after transposition (c_sub x D), so the
    # default double-buffering costs only ~2*c_sub*D bytes; pl.Buffered(1)
    # is intentionally not used (no meaningful VMEM to reclaim anymore).
    out_t = pl.pallas_call(
        _fused_affine_kernel,
        out_shape=jax.ShapeDtypeStruct((c_sub, b_padded), out_dtype),
        grid_spec=pltpu.PrefetchScalarGridSpec(
            num_scalar_prefetch=0,
            grid=(nb, nk),                                           # K axis last
            in_specs=[
                pl.BlockSpec((tile_b, tile_k), lambda b, k: (b, k)),  # x stream
                pl.BlockSpec((c_sub, tile_k), lambda b, k: (0, k)),   # fused W^T
                pl.BlockSpec((c_sub, 1), lambda b, k: (0, 0)),        # fused bias
            ],
            out_specs=pl.BlockSpec((c_sub, tile_b), lambda b, k: (0, b)),
            scratch_shapes=[pltpu.VMEM((c_sub, tile_b), jnp.float32)],
        ),
        compiler_params=pltpu.CompilerParams(
            dimension_semantics=("parallel", "arbitrary"),
            vmem_limit_bytes=vmem_limit,
        ),
        cost_estimate=pl.CostEstimate(
            flops=int(flops), transcendentals=0,
            bytes_accessed=int(bytes_accessed)),
    )(x_p, w_t, b_t)

    # Tiny epilogue: drop class/batch padding and return (B, C).
    return out_t[:class_num, :B].T


def following_extractor(x, w1, b1, w2, b2, *, compute_dtype=jnp.bfloat16):
    """One-shot convenience wrapper (prep + apply).  In a real forward loop,
    call prepare_following_extractor() once and reuse following_extractor_fused()."""
    w_t, b_t, C = prepare_following_extractor(
        w1, b1, w2, b2, compute_dtype=compute_dtype)
    return following_extractor_fused(x, w_t, b_t, C)


def init_params(key, bottleneck_dim, class_num=2):
    # Deterministic synthetic init matching nn.Linear shapes:
    #   Linear(bottleneck_dim, bottleneck_dim//2), Linear(bottleneck_dim//2, class_num)
    hidden = bottleneck_dim // 2
    k1, k2, k3, k4 = jax.random.split(key, 4)
    bound1 = 1.0 / jnp.sqrt(bottleneck_dim)
    bound2 = 1.0 / jnp.sqrt(hidden)
    # Stored as (in, out) = transpose of PyTorch's (out, in) weight.
    w1 = jax.random.uniform(k1, (bottleneck_dim, hidden), jnp.float32, -bound1, bound1)
    b1 = jax.random.uniform(k2, (1, hidden), jnp.float32, -bound1, bound1)
    w2 = jax.random.uniform(k3, (hidden, class_num), jnp.float32, -bound2, bound2)
    b2 = jax.random.uniform(k4, (1, class_num), jnp.float32, -bound2, bound2)
    return w1, b1, w2, b2


if __name__ == "__main__":
    key = jax.random.PRNGKey(0)
    kx, kp, kx2, kp2 = jax.random.split(key, 4)

    # --- small config matching the module defaults ---
    batch, bottleneck_dim, class_num = 8, 32, 2
    x = jax.random.normal(kx, (batch, bottleneck_dim), jnp.float32)
    w1, b1, w2, b2 = init_params(kp, bottleneck_dim, class_num)
    ref = (x @ w1 + b1) @ w2 + b2

    # 1) f32-prepped weights: must match the unfused reference tightly.
    w_t32, b_t32, C = prepare_following_extractor(
        w1, b1, w2, b2, compute_dtype=jnp.float32)
    out = jax.block_until_ready(following_extractor_fused(x, w_t32, b_t32, C))
    assert out.shape == (batch, class_num)
    assert jnp.allclose(out, ref, atol=1e-4, rtol=1e-4)

    # 2) default bf16-prepped weights (x streamed untouched; the kernel upcasts
    #    the tiny W tile): looser tolerance for bf16 weight rounding.
    out_bf = jax.block_until_ready(following_extractor(x, w1, b1, w2, b2))
    assert out_bf.shape == (batch, class_num)
    assert jnp.allclose(out_bf, ref, atol=5e-2, rtol=5e-2)

    # 3) larger ragged batch + a forced-small VMEM budget: exercises the
    #    multi-step "parallel" batch grid, the "arbitrary" K-blocked axis with
    #    the f32 accumulator, and the zero-padding path.
    B2, D2, C2 = 272, 2048, 3
    x2 = jax.random.normal(kx2, (B2, D2), jnp.float32)
    w1b, b1b, w2b, b2b = init_params(kp2, D2, C2)
    ref2 = (x2 @ w1b + b1b) @ w2b + b2b
    w_t2, b_t2, C2p = prepare_following_extractor(
        w1b, b1b, w2b, b2b, compute_dtype=jnp.float32)
    out2 = jax.block_until_ready(
        following_extractor_fused(x2, w_t2, b_t2, C2p, vmem_budget_bytes=5 << 20))
    assert out2.shape == (B2, C2)
    assert jnp.allclose(out2, ref2, atol=1e-2, rtol=1e-2)

    print("KERNEL_OK")
</pallas_src>

<mosaic_0001>
module attributes {stable_mosaic.version = 11 : i64} {
  func.func @_fused_affine_kernel(%arg0: i32, %arg1: i32, %arg2: memref<8x32xf32, #tpu.memory_space<vmem>>, %arg3: memref<8x32xf32, #tpu.memory_space<vmem>>, %arg4: memref<8x1xf32, #tpu.memory_space<vmem>>, %arg5: memref<8x8xf32, #tpu.memory_space<vmem>>, %arg6: memref<8x8xf32, #tpu.memory_space<vmem>>) attributes {dimension_semantics = [#tpu.dimension_semantics<parallel>, #tpu.dimension_semantics<arbitrary>], iteration_bounds = array<i64: 1, 1>, scalar_prefetch = 0 : i64, scratch_operands = 1 : i64, tpu.core_type = #tpu.core_type<tc>, window_params = [{transform_indices = @transform_0, window_bounds = array<i64: 8, 32>}, {transform_indices = @transform_1, window_bounds = array<i64: 8, 32>}, {pipeline_mode = #tpu.pipeline_mode<synchronous>, transform_indices = @transform_2, window_bounds = array<i64: 8, 1>}, {transform_indices = @transform_3, window_bounds = array<i64: 8, 8>}]} {
    %c0_i32 = arith.constant 0 : i32
    %0 = arith.cmpi eq, %arg1, %c0_i32 : i32
    %1 = arith.extui %0 : i1 to i32
    %c0_i32_0 = arith.constant 0 : i32
    %2 = arith.cmpi ne, %1, %c0_i32_0 : i32
    scf.if %2 {
      %cst_10 = arith.constant 0.000000e+00 : f32
      %12 = vector.broadcast %cst_10 : f32 to vector<8x8xf32>
      %c0_11 = arith.constant 0 : index
      %c0_12 = arith.constant 0 : index
      %13 = vector.load %arg6[%c0_11, %c0_12] : memref<8x8xf32, #tpu.memory_space<vmem>>, vector<8x8xf32>
      tpu.vector_store %arg6[%c0_11, %c0_12], %12 {strides = array<i32>} : memref<8x8xf32, #tpu.memory_space<vmem>>, vector<8x8xf32>,
    } else {
    }
    %c0 = arith.constant 0 : index
    %c0_1 = arith.constant 0 : index
    %3 = vector.load %arg2[%c0, %c0_1] : memref<8x32xf32, #tpu.memory_space<vmem>>, vector<8x32xf32>
    %c0_2 = arith.constant 0 : index
    %c0_3 = arith.constant 0 : index
    %4 = vector.load %arg3[%c0_2, %c0_3] : memref<8x32xf32, #tpu.memory_space<vmem>>, vector<8x32xf32>
    %c0_4 = arith.constant 0 : index
    %c0_5 = arith.constant 0 : index
    %5 = vector.load %arg6[%c0_4, %c0_5] : memref<8x8xf32, #tpu.memory_space<vmem>>, vector<8x8xf32>
    %cst = arith.constant dense<0.000000e+00> : vector<8x8xf32>
    %6 = tpu.matmul %4, %3, %cst {dimension_numbers = #tpu.dot_dimension_numbers<[1], [1], [0], [0], [0, 0, 1, 0], [], []>} : vector<8x32xf32>, vector<8x32xf32>, vector<8x8xf32> -> vector<8x8xf32>
    %7 = arith.addf %5, %6 : vector<8x8xf32>
    %c0_6 = arith.constant 0 : index
    %c0_7 = arith.constant 0 : index
    %8 = vector.load %arg6[%c0_6, %c0_7] : memref<8x8xf32, #tpu.memory_space<vmem>>, vector<8x8xf32>
    tpu.vector_store %arg6[%c0_6, %c0_7], %7 {strides = array<i32>} : memref<8x8xf32, #tpu.memory_space<vmem>>, vector<8x8xf32>,
    %c0_i32_8 = arith.constant 0 : i32
    %9 = arith.cmpi eq, %arg1, %c0_i32_8 : i32
    %10 = arith.extui %9 : i1 to i32
    %c0_i32_9 = arith.constant 0 : i32
    %11 = arith.cmpi ne, %10, %c0_i32_9 : i32
    scf.if %11 {
      %c0_10 = arith.constant 0 : index
      %c0_11 = arith.constant 0 : index
      %12 = vector.load %arg6[%c0_10, %c0_11] : memref<8x8xf32, #tpu.memory_space<vmem>>, vector<8x8xf32>
      %c0_12 = arith.constant 0 : index
      %c0_13 = arith.constant 0 : index
      %13 = vector.load %arg4[%c0_12, %c0_13] : memref<8x1xf32, #tpu.memory_space<vmem>>, vector<8x1xf32>
      %14 = vector.broadcast %13 : vector<8x1xf32> to vector<8x8xf32>
      %15 = arith.addf %12, %14 : vector<8x8xf32>
      %c0_14 = arith.constant 0 : index
      %c0_15 = arith.constant 0 : index
      %16 = vector.load %arg5[%c0_14, %c0_15] : memref<8x8xf32, #tpu.memory_space<vmem>>, vector<8x8xf32>
      tpu.vector_store %arg5[%c0_14, %c0_15], %15 {strides = array<i32>} : memref<8x8xf32, #tpu.memory_space<vmem>>, vector<8x8xf32>,
    } else {
    }
    return
  }
  func.func @transform_0(%arg0: i32, %arg1: i32) -> (i32, i32) {
    %c0_i32 = arith.constant 0 : i32
    return %arg0, %arg1 : i32, i32
  }
  func.func @transform_1(%arg0: i32, %arg1: i32) -> (i32, i32) {
    %c0_i32 = arith.constant 0 : i32
    %c0_i32_0 = arith.constant 0 : i32
    return %c0_i32, %arg1 : i32, i32
  }
  func.func @transform_2(%arg0: i32, %arg1: i32) -> (i32, i32) {
    %c0_i32 = arith.constant 0 : i32
    %c0_i32_0 = arith.constant 0 : i32
    %c0_i32_1 = arith.constant 0 : i32
    return %c0_i32, %c0_i32_0 : i32, i32
  }
  func.func @transform_3(%arg0: i32, %arg1: i32) -> (i32, i32) {
    %c0_i32 = arith.constant 0 : i32
    %c0_i32_0 = arith.constant 0 : i32
    return %c0_i32, %arg0 : i32, i32
  }
}

</mosaic_0001>

<bundles_post_ra>
// kernel: tpu_custom_call.1
= control target key start
LH: loop header
LB: loop body
LE: loop exit
PB: predicated region body
PF: predicated region fallthrough
CT: control target
= control target key end

     0   :  { %8 = vsyncpa [#allocation4], 0  ;;  %s264_s0 = inlined_call_operand.vmem [shape: f32[8,32], index: 0, kind: input, shape index: {}]   ;;  %s265_s1 = inlined_call_operand.hbm [shape: f32[8,32], index: 1, kind: input, shape index: {}]   ;;  %s266_s2 = inlined_call_operand.vmem [shape: f32[8,1], index: 2, kind: input, shape index: {}]   ;;  %s267_s3 = inlined_call_operand.hbm [shape: f32[8,8], index: 3, kind: output, shape index: {}]  }
   0x1   :  { %9 = vsyncpa [#allocation5], 0  ;;  %s206_s12 = smov [#allocation3]   ;;  %s158_s16 = scalar_lea.hbm %s265_s1, 128 }
   0x2   :  { %s18_s13 = sshll.u32 %s206_s12, 4  ;;  %p159_p0 = scmp.ne.s32.totalorder %s265_s1, %s158_s16  ;;  %s19_s13 = int_to_ptr.vmem [resolvable:$true] %s18_s13 }
   0x3   :  { %p162_p1 = scmp.lt.u32.totalorder %s158_s16, %s265_s1 }
   0x5   :  { %p164_p2 = pnand %p162_p1, %p159_p0 }
   0x7   :  { %167 = shalt.err (!%p164_p2)
}
   0x8   :  { %s168_s21 = scalar_lea.vmem %s19_s13, 128  ;;  %p173_p4 = scmp.lt.s32.totalorder %s19_s13, %s19_s13 }
   0x9   :  { %p169_p3 = scmp.ne.s32.totalorder %s19_s13, %s168_s21  ;;  %p174_p5 = scmp.lt.s32.totalorder %s168_s21, %s168_s21 }
   0xb   :  { %p175_p6 = por %p174_p5, %p173_p4 }
   0xd   :  { %p176_p7 = pnand %p175_p6, %p169_p3 }
   0xf   :  { %179 = shalt.err (!%p176_p7)
}
  0x10   :  { %21 = dma.hbm_to_vmem [thread:$0]  %s265_s1, 128, %s19_s13, [#allocation4]  }
  0x11   :  { %202 = dma.done.wait [#allocation4], 128  }
  0x12   :  { %203 = vsyncadd [#allocation4], 4294967168  ;;  %vm31_vm0 = vcmask 64512   ;;  %v207_v0 = vmov 0.0   ;;  %vm208_vm1 = vmmov 0   ;;  %v209_v1 = vmov 0  }
  0x13   :  { %32 = vst.msk [vmem:[#allocation2] sm:$0xff] %vm31_vm0, %v207_v0  ;;  %147 = vmatprep.subr.mxu0 %v207_v0  ;;  %149 = vmatprep.mubr.msk.f32.mxu0 %vm208_vm1, %v207_v0  ;;  %vm36_vm2 = vcmask 261120   ;;  %v33_v2 = vld [vmem:[%s264_s0] sm:$0xff]  ;;  %v34_v4 = vld [vmem:[#allocation3] sm:$0xff]  ;;  %s210_s1 = smov [#allocation6]  }
  0x14   :  { %157 = vset.pattern.permute.xlu0 %v209_v1  ;;  %v120_v3 = vld [vmem:[%s266_s2] sm:$0xff]  ;;  %148 = vmatpush3.xpose.msk.msra.mxu0 %vm36_vm2, %v33_v2  ;;  %s134_s28 = sshll.u32 %s210_s1, 4  ;;  %s135_s28 = int_to_ptr.vmem [resolvable:$true] %s134_s28 }
  0x15   :  { %123 = vperm.xlu0 %157, %v120_v3   ;;  %s180_s0 = scalar_lea.vmem %s135_s28, 128  ;;  %p185_p9 = scmp.lt.s32.totalorder %s135_s28, %s135_s28 }
  0x16   :  { %p181_p8 = scmp.ne.s32.totalorder %s135_s28, %s180_s0  ;;  %p186_p10 = scmp.lt.s32.totalorder %s180_s0, %s180_s0 }
  0x17   :  { %150 = vmatmul.mubr.msk.f32.vlgmr.msra.gmra.mrb[0].mxu0 %vm36_vm2, %v34_v4 }
  0x18   :  { %p187_p11 = por %p186_p10, %p185_p9 }
  0x1a   :  { %v35_v5 = vld [vmem:[#allocation2] sm:$0xff]  ;;  %p188_p12 = pnand %p187_p11, %p181_p8 }
  0x94   :  { %v124_v9 = vpop.permute.xlu0 %123 }
  0xea   :  { %v109_v6 = vpop.f32.mrb[0].mxu0 }
  0xeb   :  { %v113_v7 = vadd.f32 %v109_v6, %v35_v5  ;;  %v151_v8 = vpop.f32.mrb[1].mxu0 }
  0xed   :  { %115 = vst.msk [vmem:[#allocation2] sm:$0xff] %vm31_vm0, %v113_v7 }
  0xf4   :  { %v119_v10 = vld [vmem:[#allocation2] sm:$0xff] }
  0xf5   :  { %v126_v11 = vadd.f32 %v124_v9, %v119_v10 }
  0xf7   :  { %127 = vst.msk [vmem:[#allocation6] sm:$0xff] %vm31_vm0, %v126_v11 }
  0xf8   :  { %191 = shalt.err (!%p188_p12)
}
  0xf9   :  { %s192_s30 = scalar_lea.hbm %s267_s3, 128 }
  0xfa   :  { %p193_p13 = scmp.ne.s32.totalorder %s267_s3, %s192_s30  ;;  %p196_p0 = scmp.lt.u32.totalorder %s192_s30, %s267_s3 }
  0xfc   :  { %p198_p1 = pnand %p196_p0, %p193_p13 }
  0xfe   :  { %201 = shalt.err (!%p198_p1)
}
  0xff   :  { %137 = dma.vmem_to_hbm [thread:$0]  %s135_s28, 128, %s267_s3, [#allocation5]  }
 0x100   :  { %204 = dma.done.wait [#allocation5], 128  }
 0x101   :  { %205 = vsyncadd [#allocation5], 4294967168 }
 0x102   :  { %141 = vsyncpa [#allocation4], 1 }
 0x103   :  { %142 = vsyncpa [#allocation5], 1 }

</bundles_post_ra>
